<compile_context>
chip_gen: v7x
topology: tpu7x:2x2x1
jax: 0.10.0
libtpu: 0.0.40
codegen_flags: <defaults>
</compile_context>

<pallas_src>
import math

import jax
import jax.numpy as jnp
from jax import lax
from jax.experimental import pallas as pl
from jax.experimental.pallas import tpu as pltpu


# ----------------------------------------------------------------------------
# Tiling / padding helpers
# ----------------------------------------------------------------------------

def _tile_and_pad(dim, cap, align):
    """Pick (tile, padded_dim).

    dim <= cap          -> one full-extent block (always legal on TPU).
    aligned divisor<=cap -> use it, no padding.
    otherwise           -> aligned tile of ~cap and pad dim up to a multiple
                           (wrapper pads with zeros and slices the output), so
                           we never fall back to a VMEM-blowing untiled block.
    """
    if dim <= cap:
        return dim, dim
    t = (cap // align) * align
    while t >= align:
        if dim % t == 0:
            return t, dim
        t -= align
    t = (cap // align) * align
    return t, pl.cdiv(dim, t) * t


def _pad_axis(a, axis, new_size):
    if a.shape[axis] == new_size:
        return a
    pad = [(0, 0)] * a.ndim
    pad[axis] = (0, new_size - a.shape[axis])
    return jnp.pad(a, pad)


def _nbytes(a):
    return a.size * a.dtype.itemsize


# ----------------------------------------------------------------------------
# Tiled linear kernel:  y = x @ W + b   (bf16 in/out, f32 accumulate)
# ----------------------------------------------------------------------------

def _linear_kernel(x_ref, w_ref, b_ref, o_ref, acc_ref):
    k = pl.program_id(2)

    @pl.when(k == 0)
    def _():
        acc_ref[...] = jnp.zeros_like(acc_ref)

    acc_ref[...] += jnp.dot(x_ref[...], w_ref[...],
                            preferred_element_type=jnp.float32)

    @pl.when(k == pl.num_programs(2) - 1)
    def _():
        o_ref[...] = (acc_ref[...] + b_ref[...]).astype(o_ref.dtype)


def linear_pallas(x2d, w, b, *, tm_cap=512, tn_cap=512, tk_cap=512):
    """x2d: (M, K), w: (K, N), b: (N,)  ->  (M, N) in x2d.dtype."""
    M, K = x2d.shape
    N = w.shape[1]
    sub = 16 if x2d.dtype == jnp.bfloat16 else 8
    tm, Mp = _tile_and_pad(M, tm_cap, sub)
    tn, Np = _tile_and_pad(N, tn_cap, 128)
    tk, Kp = _tile_and_pad(K, tk_cap, 128)

    x2d = _pad_axis(_pad_axis(x2d, 0, Mp), 1, Kp)
    w = _pad_axis(_pad_axis(w, 0, Kp), 1, Np)
    b2 = _pad_axis(b.reshape(1, N).astype(jnp.float32), 1, Np)

    out = pl.pallas_call(
        _linear_kernel,
        out_shape=jax.ShapeDtypeStruct((Mp, Np), x2d.dtype),
        grid_spec=pltpu.PrefetchScalarGridSpec(
            num_scalar_prefetch=0,
            grid=(Mp // tm, Np // tn, Kp // tk),
            in_specs=[
                pl.BlockSpec((tm, tk), lambda i, j, k: (i, k)),
                pl.BlockSpec((tk, tn), lambda i, j, k: (k, j)),
                pl.BlockSpec((1, tn), lambda i, j, k: (0, j)),
            ],
            out_specs=pl.BlockSpec((tm, tn), lambda i, j, k: (i, j)),
            scratch_shapes=[pltpu.VMEM((tm, tn), jnp.float32)],
        ),
        compiler_params=pltpu.CompilerParams(
            dimension_semantics=("parallel", "parallel", "arbitrary")),
    )(x2d, w, b2)
    if (Mp, Np) != (M, N):
        out = out[:M, :N]
    return out


# ----------------------------------------------------------------------------
# Fused Q-projection + multi-head reprogramming attention + output projection
# ----------------------------------------------------------------------------

def _fused_attn_kernel(x_ref, wq_ref, bq_ref, k_ref, v_ref, wo_ref, bo_ref,
                       o_ref, acc_ref):
    # x_ref  : (1, tl, d_model)  streamed target block
    # wq_ref : (H, d_model, E)   resident, scale pre-baked, bf16
    # bq_ref : (H, 1, E)         resident, scale pre-baked, f32
    # k_ref  : (H, S, E)         resident, bf16
    # v_ref  : (H, S, E)         resident, bf16
    # wo_ref : (H, E, d_llm)     resident, bf16
    # bo_ref : (1, d_llm)        resident, f32
    # o_ref  : (1, tl, d_llm)    lane-dense output block
    # acc_ref: (tl, d_llm)       f32 scratch accumulator
    n_heads = k_ref.shape[0]
    cdt = k_ref.dtype

    x = x_ref[0]                                   # (tl, d_model), loaded once
    acc_ref[...] = jnp.zeros_like(acc_ref)

    for h in range(n_heads):                       # static unroll; leading-axis
        # Fused Q projection for this head (f32 accumulate; scale in Wq/bq).
        q_h = (jnp.dot(x, wq_ref[h], preferred_element_type=jnp.float32)
               + bq_ref[h]).astype(cdt)            # (tl, E)
        # scores = q_h @ k_h^T  (contract last axes, no materialized transpose)
        scores = lax.dot_general(q_h, k_ref[h], (((1,), (1,)), ((), ())),
                                 preferred_element_type=jnp.float32)  # (tl, S)
        m = jnp.max(scores, axis=-1, keepdims=True)
        p = jnp.exp(scores - m)                    # f32 exp (v5e-safe EUP path)
        inv = pl.reciprocal(jnp.sum(p, axis=-1, keepdims=True), approx=True)
        a = (p * inv).astype(cdt)                  # (tl, S)
        # TODO(synk): training-mode attention dropout (prng mask) not
        # implemented; inference forward treats nn.Dropout as identity.
        ctx = jnp.dot(a, v_ref[h], preferred_element_type=jnp.float32)  # (tl,E)
        # Per-head output projection accumulated directly into the lane-dense
        # (tl, d_llm) accumulator: no concat of E-wide pieces, no vreg blowup.
        acc_ref[...] += jnp.dot(ctx.astype(cdt), wo_ref[h],
                                preferred_element_type=jnp.float32)

    o_ref[0] = (acc_ref[...] + bo_ref[...]).astype(o_ref.dtype)


def reprogramming_attention_pallas(x, wq_h, bq_h, k_h, v_h, wo_h, bo, *,
                                   tl_cap=256):
    """x: (B, L, d_model); wq_h: (H, d_model, E); bq_h: (H, 1, E) f32;
    k_h/v_h: (H, S, E); wo_h: (H, E, d_llm); bo: (1, d_llm) f32
    ->  (B, L, d_llm) in x.dtype."""
    B, L, d_model = x.shape
    H, S, E = k_h.shape
    d_llm = wo_h.shape[-1]

    sub = 16 if x.dtype == jnp.bfloat16 else 8
    tl, Lp = _tile_and_pad(L, tl_cap, sub)
    x = _pad_axis(x, 1, Lp)
    nl = Lp // tl

    # VMEM budget: resident blocks (worst-case double-buffered) + streamed
    # x / out tiles + f32 accumulator.
    itemsize = x.dtype.itemsize
    resident = sum(_nbytes(a) for a in (wq_h, bq_h, k_h, v_h, wo_h, bo))
    streamed = 2 * tl * (d_model + d_llm) * itemsize
    est = 2 * resident + streamed + tl * d_llm * 4 + (4 << 20)
    vmem_limit = int(min(100 * 2**20, max(est, 32 * 2**20)))

    out = pl.pallas_call(
        _fused_attn_kernel,
        out_shape=jax.ShapeDtypeStruct((B, Lp, d_llm), x.dtype),
        grid_spec=pltpu.PrefetchScalarGridSpec(
            num_scalar_prefetch=0,
            # Both axes parallel (megacore-shardable).  If B can be 1 at
            # production scale, put the L axis first so v7x's 2 TCs both work.
            grid=(B, nl),
            in_specs=[
                pl.BlockSpec((1, tl, d_model), lambda b, l: (b, l, 0)),
                # Constant block index -> DMA'd once, kept resident in VMEM.
                pl.BlockSpec((H, d_model, E), lambda b, l: (0, 0, 0)),
                pl.BlockSpec((H, 1, E), lambda b, l: (0, 0, 0)),
                pl.BlockSpec((H, S, E), lambda b, l: (0, 0, 0)),
                pl.BlockSpec((H, S, E), lambda b, l: (0, 0, 0)),
                pl.BlockSpec((H, E, d_llm), lambda b, l: (0, 0, 0)),
                pl.BlockSpec((1, d_llm), lambda b, l: (0, 0)),
            ],
            out_specs=pl.BlockSpec((1, tl, d_llm), lambda b, l: (b, l, 0)),
            scratch_shapes=[pltpu.VMEM((tl, d_llm), jnp.float32)],
        ),
        compiler_params=pltpu.CompilerParams(
            dimension_semantics=("parallel", "parallel"),
            vmem_limit_bytes=vmem_limit),
    )(x, wq_h, bq_h, k_h, v_h, wo_h, bo)
    if Lp != L:
        out = out[:, :L, :]
    return out


# ----------------------------------------------------------------------------
# ReprogrammingLayer forward
# ----------------------------------------------------------------------------

def init_params(key, d_model, n_heads, d_keys, d_llm, dtype=jnp.float32):
    """Deterministic synthetic parameters (shapes match the nn.Module;
    Linear weights stored pre-transposed as (in_features, out_features))."""
    dk = d_keys * n_heads
    ks = jax.random.split(key, 8)

    def lin(kw, kb, fan_in, fan_out):
        bound = 1.0 / math.sqrt(fan_in)
        w = jax.random.uniform(kw, (fan_in, fan_out), dtype, -bound, bound)
        b = jax.random.uniform(kb, (fan_out,), dtype, -bound, bound)
        return w, b

    wq, bq = lin(ks[0], ks[1], d_model, dk)
    wk, bk = lin(ks[2], ks[3], d_llm, dk)
    wv, bv = lin(ks[4], ks[5], d_llm, dk)
    wo, bo = lin(ks[6], ks[7], dk, d_llm)
    return dict(wq=wq, bq=bq, wk=wk, bk=bk, wv=wv, bv=bv, wo=wo, bo=bo)


def reprogramming_layer_forward(params, target_embedding, source_embedding,
                                value_embedding, n_heads,
                                compute_dtype=jnp.bfloat16):
    """Inference forward (dropout = identity).  bf16 compute, f32 accumulate."""
    B, L, d_model = target_embedding.shape
    S, d_llm = source_embedding.shape
    H = n_heads
    dk = params["wq"].shape[1]
    E = dk // H
    scale = 1.0 / math.sqrt(E)
    cdt = compute_dtype

    # K / V projections: standalone tiled matmuls (small; reused by every
    # (b, l) tile of the attention kernel).
    k = linear_pallas(source_embedding.astype(cdt), params["wk"].astype(cdt),
                      params["bk"])                                  # (S, H*E)
    v = linear_pallas(value_embedding.astype(cdt), params["wv"].astype(cdt),
                      params["bv"])                                  # (S, H*E)

    # Head-split layouts with a leading head axis: the attention kernel only
    # takes leading-index slices of resident VMEM blocks (no E-wide lane
    # slicing).  One-off tiny XLA reshapes/transposes.
    k_heads = k.reshape(S, H, E).transpose(1, 0, 2)                  # (H, S, E)
    v_heads = v.reshape(S, H, E).transpose(1, 0, 2)                  # (H, S, E)
    # Q projection is fused into the attention kernel; bake 1/sqrt(E) into it.
    wq_heads = (params["wq"] * scale).reshape(d_model, H, E) \
                                     .transpose(1, 0, 2).astype(cdt)  # (H,dm,E)
    bq_heads = (params["bq"] * scale).reshape(H, 1, E) \
                                     .astype(jnp.float32)             # (H,1,E)
    wo_heads = params["wo"].reshape(H, E, d_llm).astype(cdt)          # (H,E,dl)
    bo = params["bo"].reshape(1, d_llm).astype(jnp.float32)

    return reprogramming_attention_pallas(
        target_embedding.astype(cdt), wq_heads, bq_heads,
        k_heads, v_heads, wo_heads, bo)


# Pure-JAX f32 reference for verification.
def reference_forward(params, target_embedding, source_embedding,
                      value_embedding, n_heads):
    B, L, _ = target_embedding.shape
    S, _ = source_embedding.shape
    H = n_heads
    dk = params["wq"].shape[1]
    E = dk // H
    q = (target_embedding @ params["wq"] + params["bq"]).reshape(B, L, H, E)
    k = (source_embedding @ params["wk"] + params["bk"]).reshape(S, H, E)
    v = (value_embedding @ params["wv"] + params["bv"]).reshape(S, H, E)
    scores = jnp.einsum("blhe,she->bhls", q, k)
    a = jax.nn.softmax(scores / math.sqrt(E), axis=-1)
    out = jnp.einsum("bhls,she->blhe", a, v).reshape(B, L, H * E)
    return out @ params["wo"] + params["bo"]


if __name__ == "__main__":
    # Small shapes consistent with the module's forward.
    B, L, S = 2, 8, 16
    d_model, n_heads, d_keys, d_llm = 32, 4, 8, 48

    key = jax.random.PRNGKey(0)
    kp, kt, ks, kv = jax.random.split(key, 4)

    params = init_params(kp, d_model, n_heads, d_keys, d_llm)
    target = jax.random.normal(kt, (B, L, d_model), jnp.float32)
    source = jax.random.normal(ks, (S, d_llm), jnp.float32)
    value = jax.random.normal(kv, (S, d_llm), jnp.float32)

    out = reprogramming_layer_forward(params, target, source, value, n_heads)
    out = jax.block_until_ready(out)

    ref = reference_forward(params, target, source, value, n_heads)
    assert out.shape == (B, L, d_llm)
    # bf16 compute (f32 accumulation) + approx softmax reciprocal -> loose tol.
    assert jnp.allclose(out.astype(jnp.float32), ref, atol=5e-2, rtol=5e-2), \
        "mismatch vs reference"

    print("KERNEL_OK")
</pallas_src>

<mosaic_0001>
module attributes {stable_mosaic.version = 11 : i64} {
  func.func @_linear_kernel(%arg0: i32, %arg1: i32, %arg2: i32, %arg3: memref<16x48xbf16, #tpu.memory_space<vmem>>, %arg4: memref<48x32xbf16, #tpu.memory_space<vmem>>, %arg5: memref<1x32xf32, #tpu.memory_space<vmem>>, %arg6: memref<16x32xbf16, #tpu.memory_space<vmem>>, %arg7: memref<16x32xf32, #tpu.memory_space<vmem>>) attributes {dimension_semantics = [#tpu.dimension_semantics<parallel>, #tpu.dimension_semantics<parallel>, #tpu.dimension_semantics<arbitrary>], iteration_bounds = array<i64: 1, 1, 1>, scalar_prefetch = 0 : i64, scratch_operands = 1 : i64, tpu.core_type = #tpu.core_type<tc>, window_params = [{transform_indices = @transform_0, window_bounds = array<i64: 16, 48>}, {transform_indices = @transform_1, window_bounds = array<i64: 48, 32>}, {transform_indices = @transform_2, window_bounds = array<i64: 1, 32>}, {transform_indices = @transform_3, window_bounds = array<i64: 16, 32>}]} {
    %c0_i32 = arith.constant 0 : i32
    %0 = arith.cmpi eq, %arg2, %c0_i32 : i32
    %1 = arith.extui %0 : i1 to i32
    %c0_i32_0 = arith.constant 0 : i32
    %2 = arith.cmpi ne, %1, %c0_i32_0 : i32
    scf.if %2 {
      %cst_10 = arith.constant 0.000000e+00 : f32
      %12 = vector.broadcast %cst_10 : f32 to vector<16x32xf32>
      %c0_11 = arith.constant 0 : index
      %c0_12 = arith.constant 0 : index
      %13 = vector.load %arg7[%c0_11, %c0_12] : memref<16x32xf32, #tpu.memory_space<vmem>>, vector<16x32xf32>
      tpu.vector_store %arg7[%c0_11, %c0_12], %12 {strides = array<i32>} : memref<16x32xf32, #tpu.memory_space<vmem>>, vector<16x32xf32>,
    } else {
    }
    %c0 = arith.constant 0 : index
    %c0_1 = arith.constant 0 : index
    %3 = vector.load %arg7[%c0, %c0_1] : memref<16x32xf32, #tpu.memory_space<vmem>>, vector<16x32xf32>
    %c0_2 = arith.constant 0 : index
    %c0_3 = arith.constant 0 : index
    %4 = vector.load %arg3[%c0_2, %c0_3] : memref<16x48xbf16, #tpu.memory_space<vmem>>, vector<16x48xbf16>
    %c0_4 = arith.constant 0 : index
    %c0_5 = arith.constant 0 : index
    %5 = vector.load %arg4[%c0_4, %c0_5] : memref<48x32xbf16, #tpu.memory_space<vmem>>, vector<48x32xbf16>
    %cst = arith.constant dense<0.000000e+00> : vector<16x32xf32>
    %6 = tpu.matmul %4, %5, %cst {dimension_numbers = #tpu.dot_dimension_numbers<[1], [0], [0], [1], [0, 0, 1, 1], [], []>} : vector<16x48xbf16>, vector<48x32xbf16>, vector<16x32xf32> -> vector<16x32xf32>
    %7 = arith.addf %3, %6 : vector<16x32xf32>
    %c0_6 = arith.constant 0 : index
    %c0_7 = arith.constant 0 : index
    %8 = vector.load %arg7[%c0_6, %c0_7] : memref<16x32xf32, #tpu.memory_space<vmem>>, vector<16x32xf32>
    tpu.vector_store %arg7[%c0_6, %c0_7], %7 {strides = array<i32>} : memref<16x32xf32, #tpu.memory_space<vmem>>, vector<16x32xf32>,
    %c0_i32_8 = arith.constant 0 : i32
    %9 = arith.cmpi eq, %arg2, %c0_i32_8 : i32
    %10 = arith.extui %9 : i1 to i32
    %c0_i32_9 = arith.constant 0 : i32
    %11 = arith.cmpi ne, %10, %c0_i32_9 : i32
    scf.if %11 {
      %c0_10 = arith.constant 0 : index
      %c0_11 = arith.constant 0 : index
      %12 = vector.load %arg7[%c0_10, %c0_11] : memref<16x32xf32, #tpu.memory_space<vmem>>, vector<16x32xf32>
      %c0_12 = arith.constant 0 : index
      %c0_13 = arith.constant 0 : index
      %13 = vector.load %arg5[%c0_12, %c0_13] : memref<1x32xf32, #tpu.memory_space<vmem>>, vector<1x32xf32>
      %14 = vector.broadcast %13 : vector<1x32xf32> to vector<16x32xf32>
      %15 = arith.addf %12, %14 : vector<16x32xf32>
      %16 = arith.truncf %15 : vector<16x32xf32> to vector<16x32xbf16>
      %c0_14 = arith.constant 0 : index
      %c0_15 = arith.constant 0 : index
      %17 = vector.load %arg6[%c0_14, %c0_15] : memref<16x32xbf16, #tpu.memory_space<vmem>>, vector<16x32xbf16>
      tpu.vector_store %arg6[%c0_14, %c0_15], %16 {strides = array<i32>} : memref<16x32xbf16, #tpu.memory_space<vmem>>, vector<16x32xbf16>,
    } else {
    }
    return
  }
  func.func @transform_0(%arg0: i32, %arg1: i32, %arg2: i32) -> (i32, i32) {
    %c0_i32 = arith.constant 0 : i32
    return %arg0, %arg2 : i32, i32
  }
  func.func @transform_1(%arg0: i32, %arg1: i32, %arg2: i32) -> (i32, i32) {
    %c0_i32 = arith.constant 0 : i32
    return %arg2, %arg1 : i32, i32
  }
  func.func @transform_2(%arg0: i32, %arg1: i32, %arg2: i32) -> (i32, i32) {
    %c0_i32 = arith.constant 0 : i32
    %c0_i32_0 = arith.constant 0 : i32
    return %c0_i32, %arg1 : i32, i32
  }
  func.func @transform_3(%arg0: i32, %arg1: i32, %arg2: i32) -> (i32, i32) {
    %c0_i32 = arith.constant 0 : i32
    return %arg0, %arg1 : i32, i32
  }
}

</mosaic_0001>

<bundles_post_ra>
// kernel: tpu_custom_call.1
= control target key start
LH: loop header
LB: loop body
LE: loop exit
PB: predicated region body
PF: predicated region fallthrough
CT: control target
= control target key end

     0   :  { %v204_v1 = vmov 0.0   ;;  %vm205_vm0 = vmmov 0   ;;  %vm20_vm1 = vcmask 261120   ;;  %s260_s0 = inlined_call_operand.vmem [shape: bf16[16,48], index: 0, kind: input, shape index: {}]   ;;  %s261_s1 = inlined_call_operand.vmem [shape: bf16[48,32], index: 1, kind: input, shape index: {}]   ;;  %s262_s2 = inlined_call_operand.vmem [shape: f32[1,32], index: 2, kind: input, shape index: {}]   ;;  %s263_s3 = inlined_call_operand.hbm [shape: bf16[16,32], index: 3, kind: output, shape index: {}]  }
   0x1   :  { %v176_v0 = vld [vmem:[%s261_s1] sm:$0xff]   ;;  %161 = vmatprep.subr.bf16.mxu0 %v204_v1  ;;  %v177_v2 = vld [vmem:[%s261_s1 + $0x8] sm:$0xff]   ;;  %167 = vmatprep.mubr.msk.bf16.mxu0 %vm205_vm0, %v204_v1  ;;  %21 = vst.msk [vmem:[#allocation2] sm:$0xff] %vm20_vm1, %v204_v1  ;;  %22 = vst.msk [vmem:[#allocation2 + $0x8] sm:$0xff] %vm20_vm1, %v204_v1 }
   0x2   :  { %162 = vmatpush3.bf16.msra.mxu0 %v176_v0 }
   0x3   :  { %163 = vmatprep.subr.bf16.mxu0 %v204_v1 }
   0x4   :  { %8 = vsyncpa [#allocation4], 0  ;;  %v178_v3 = vld [vmem:[%s261_s1 + $0x10] sm:$0xff]   ;;  %v179_v4 = vld [vmem:[%s260_s0] sm:$0xff]   ;;  %vm56_vm2 = vcmask 392192   ;;  %s206_s0 = smov [#allocation3]  }
   0x5   :  { %v152_v13 = vld [vmem:[%s262_s2] ss:$0 sm:$0xff]  ;;  %s136_s21 = sshll.u32 %s206_s0, 4  ;;  %vm128_vm3 = vcmask 257024   ;;  %s137_s21 = int_to_ptr.vmem [resolvable:$true] %s136_s21 }
   0x6   :  { %164 = vmatpush3.bf16.msra.mxu0 %v177_v2  ;;  %s180_s22 = scalar_lea.vmem %s137_s21, 128  ;;  %p185_p1 = scmp.lt.s32.totalorder %s137_s21, %s137_s21 }
   0x7   :  { %165 = vmatprep.subr.bf16.mxu0 %v204_v1  ;;  %p181_p0 = scmp.ne.s32.totalorder %s137_s21, %s180_s22  ;;  %p186_p2 = scmp.lt.s32.totalorder %s180_s22, %s180_s22 }
   0x8   :  { %v23_v5 = vld [vmem:[#allocation2] sm:$0xff]  ;;  %v24_v7 = vld [vmem:[#allocation2 + $0x8] sm:$0xff] }
   0x9   :  { %p187_p3 = por %p186_p2, %p185_p1 }
   0xa   :  { %166 = vmatpush3.bf16.msra.mxu0 %v178_v3 }
   0xb   :  { %p188_p4 = pnand %p187_p3, %p181_p0 }
   0xd   :  { %168 = vmatmul.mubr.msk.bf16.vlgmr.msra.gmra.mrb[0].mxu0 %vm56_vm2, %v179_v4 }
  0xe0   :  { %v94_v6 = vpop.f32.mrb[0].mxu0 }
  0xe1   :  { %v101_v8 = vadd.f32 %v94_v6, %v23_v5  ;;  %v169_v9 = vpop.f32.mrb[1].mxu0 }
  0xe2   :  { %v97_v10 = vpop.f32.mrb[2].mxu0 }
  0xe3   :  { %104 = vst.msk [vmem:[#allocation2] sm:$0xff] %vm20_vm1, %v101_v8  ;;  %v102_v11 = vadd.f32 %v97_v10, %v24_v7  ;;  %v170_v12 = vpop.f32.mrb[3].mxu0 }
  0xe5   :  { %105 = vst.msk [vmem:[#allocation2 + $0x8] sm:$0xff] %vm20_vm1, %v102_v11 }
  0xea   :  { %v109_v14 = vld [vmem:[#allocation2] sm:$0xff] }
  0xeb   :  { %v118_v15 = vadd.f32 %v152_v13, %v109_v14 }
  0xec   :  { %v110_v16 = vld [vmem:[#allocation2 + $0x8] sm:$0xff] }
  0xed   :  { %v119_v17 = vadd.f32 %v152_v13, %v110_v16  ;;  %v155_v18 = vpack.c.bf16 %v118_v15, %v118_v15 }
  0xef   :  { %v156_v19 = vpack.c.bf16 %v119_v17, %v119_v17  ;;  %129 = vst.msk [vmem:[#allocation3] sm:$0xf] %vm128_vm3, %v155_v18 }
  0xf1   :  { %130 = vst.msk [vmem:[#allocation3 + $0x4] sm:$0xf] %vm128_vm3, %v156_v19 }
  0xf2   :  { %191 = shalt.err (!%p188_p4)
}
  0xf3   :  { %s192_s24 = scalar_lea.hbm %s263_s3, 128 }
  0xf4   :  { %p193_p5 = scmp.ne.s32.totalorder %s263_s3, %s192_s24  ;;  %p196_p6 = scmp.lt.u32.totalorder %s192_s24, %s263_s3 }
  0xf6   :  { %p198_p7 = pnand %p196_p6, %p193_p5 }
  0xf8   :  { %201 = shalt.err (!%p198_p7)
}
  0xf9   :  { %s207_s29 = smov 64   ;;  %s208_s30 = smov 4  }
  0xfa   :  { %142 = dma.vmem_to_hbm [thread:$0]  %s137_s21, 128, %s263_s3, [#allocation4], %s207_s29, %s207_s29, %s208_s30  }
  0xfb   :  { %202 = dma.done.wait [#allocation4], 128  }
  0xfc   :  { %203 = vsyncadd [#allocation4], 4294967168 }
  0xfd   :  { %146 = vsyncpa [#allocation4], 1 }

</bundles_post_ra>
